<compile_context>
chip_gen: v7x
topology: tpu7x:2x2x1
jax: 0.10.0
libtpu: 0.0.40
codegen_flags: <defaults>
</compile_context>

<pallas_src>
import functools

import numpy as np
import jax
import jax.numpy as jnp
from jax.experimental import pallas as pl
from jax.experimental.pallas import tpu as pltpu


def _round_up(x, m):
    return ((x + m - 1) // m) * m


def _banded_dequant_kernel(x_ref, w_ref, o_ref):
    # (TB, tn*bits) bf16  x  (tn*bits, tn) bf16  ->  (TB, tn) f32 on the MXU.
    o_ref[...] = jnp.dot(
        x_ref[...], w_ref[...], preferred_element_type=jnp.float32
    )


def _build_tile_weights(bits, tn):
    """Shared per-tile weight band: W[j*bits + i, j] = 2^(bits-1-i)."""
    W = np.zeros((tn * bits, tn), dtype=np.float32)
    rows = np.arange(tn * bits)
    W[rows, rows // bits] = 2.0 ** (bits - 1 - (rows % bits))
    return jnp.asarray(W, dtype=jnp.bfloat16)


def banded_dequantize(x_bits, bits, n, *, batch_tile=512, n_tile=512):
    """Decode groups of `bits` bits (MSB first) -> [batch, n] float32.

    x_bits: [batch, n*bits] 0/1 values (any float/int dtype).
    """
    batch, total_bits = x_bits.shape
    assert total_bits == n * bits, (total_bits, n, bits)
    if n == 0:
        return jnp.zeros((batch, 0), jnp.float32)

    # Lane-dense N tile (multiple of 128); K band is tn*bits (also a multiple
    # of 128).  Batch tile is a multiple of 16 for bf16 sublane tiling.
    tn = min(_round_up(n, 128), n_tile)
    nt = -(-n // tn)
    Np = nt * tn
    band_k = tn * bits
    Kp = Np * bits
    TB = min(_round_up(batch, 16), batch_tile)
    Bp = _round_up(batch, TB)

    # Pad x (zeros decode to zeros and are sliced off) and cast to bf16
    # (exact for 0/1 bits).
    xb = x_bits.astype(jnp.bfloat16)
    x_p = jnp.pad(xb, ((0, Bp - batch), (0, Kp - total_bits)))
    W = _build_tile_weights(bits, tn)

    cost = pl.CostEstimate(
        flops=2 * Bp * Np * band_k,
        transcendentals=0,
        bytes_accessed=Bp * Kp * 2 + band_k * tn * 2 + Bp * Np * 4,
    )

    out = pl.pallas_call(
        _banded_dequant_kernel,
        out_shape=jax.ShapeDtypeStruct((Bp, Np), jnp.float32),
        grid_spec=pltpu.PrefetchScalarGridSpec(
            num_scalar_prefetch=0,
            grid=(Bp // TB, Np // tn),
            in_specs=[
                # x: batch tile b, K band t (band_k columns per N tile).
                pl.BlockSpec((TB, band_k), lambda b, t: (b, t)),
                # W: same band for every tile -> stays resident in VMEM.
                pl.BlockSpec((band_k, tn), lambda b, t: (0, 0)),
            ],
            out_specs=pl.BlockSpec((TB, tn), lambda b, t: (b, t)),
        ),
        compiler_params=pltpu.CompilerParams(
            dimension_semantics=("parallel", "parallel"),
        ),
        cost_estimate=cost,
    )(x_p, W)

    return out[:batch, :n]


def mix_dequantization(x, *, dim, mixq_factor, n_q_bit):
    """Forward of MixDequantizationLayer. x: [batch, total_bits] bits."""
    B = int(n_q_bit)
    # bf16 inputs + f32 accumulation are exact for bits in {0,1} and weights
    # that are powers of two <= 2^(B-1) with group sums <= 2^B - 1.
    assert 2 <= B <= 8, "n_q_bit out of the exactness-verified range"
    dim1 = round(dim * mixq_factor)  # same rounding as the PyTorch module
    assert dim1 > 0
    dim2 = dim - dim1
    split = dim1 * (B - 1)

    x1 = x[..., :split]
    x2 = x[..., split:]
    o1 = banded_dequantize(x1, B - 1, dim1)
    o2 = banded_dequantize(x2, B, dim2)
    return jnp.concatenate([o1, o2], axis=-1)


mix_dequantization_jit = jax.jit(
    mix_dequantization, static_argnames=("dim", "mixq_factor", "n_q_bit")
)


def reference_mix_dequantization(x, dim, mixq_factor, n_q_bit):
    """Pure numpy reference mirroring the PyTorch forward exactly."""
    B = n_q_bit
    dim1 = round(dim * mixq_factor)
    x = np.asarray(x, dtype=np.float32)
    x1 = x[..., : dim1 * (B - 1)]
    x2 = x[..., dim1 * (B - 1):]

    def bit2num(bits, b):
        bits = bits.reshape(-1, bits.shape[1] // b, b)
        num = np.zeros(bits[:, :, 0].shape, dtype=np.float32)
        for i in range(b):
            num = num + bits[:, :, i] * 2.0 ** (b - 1 - i)
        return num

    return np.concatenate([bit2num(x1, B - 1), bit2num(x2, B)], axis=-1)


if __name__ == "__main__":
    class Cfg:
        mixq_factor = 0.25
        n_q_bit = 4

    cfg = Cfg()
    dim = 32
    batch = 8

    B = cfg.n_q_bit
    dim1 = round(dim * cfg.mixq_factor)
    dim2 = dim - dim1
    total_bits = dim1 * (B - 1) + dim2 * B  # 8*3 + 24*4 = 120

    key = jax.random.PRNGKey(0)
    x = jax.random.bernoulli(key, p=0.5, shape=(batch, total_bits)).astype(
        jnp.float32
    )

    out = mix_dequantization_jit(
        x, dim=dim, mixq_factor=cfg.mixq_factor, n_q_bit=cfg.n_q_bit
    )
    out = jax.block_until_ready(out)

    ref = reference_mix_dequantization(
        np.asarray(x), dim, cfg.mixq_factor, cfg.n_q_bit
    )
    assert out.shape == (batch, dim), out.shape
    assert np.allclose(np.asarray(out), ref, atol=0.0, rtol=0.0), (
        "mismatch vs reference"
    )

    print("KERNEL_OK")
</pallas_src>

<mosaic_0001>
module attributes {stable_mosaic.version = 11 : i64} {
  func.func @_banded_dequant_kernel(%arg0: i32, %arg1: i32, %arg2: memref<16x512xbf16, #tpu.memory_space<vmem>>, %arg3: memref<512x128xbf16, #tpu.memory_space<vmem>>, %arg4: memref<16x128xf32, #tpu.memory_space<vmem>>) attributes {dimension_semantics = [#tpu.dimension_semantics<parallel>, #tpu.dimension_semantics<parallel>], iteration_bounds = array<i64: 1, 1>, scalar_prefetch = 0 : i64, scratch_operands = 0 : i64, tpu.core_type = #tpu.core_type<tc>, window_params = [{transform_indices = @transform_0, window_bounds = array<i64: 16, 512>}, {pipeline_mode = #tpu.pipeline_mode<synchronous>, transform_indices = @transform_1, window_bounds = array<i64: 512, 128>}, {transform_indices = @transform_2, window_bounds = array<i64: 16, 128>}]} {
    %c0 = arith.constant 0 : index
    %c0_0 = arith.constant 0 : index
    %0 = vector.load %arg2[%c0, %c0_0] : memref<16x512xbf16, #tpu.memory_space<vmem>>, vector<16x512xbf16>
    %c0_1 = arith.constant 0 : index
    %c0_2 = arith.constant 0 : index
    %1 = vector.load %arg3[%c0_1, %c0_2] : memref<512x128xbf16, #tpu.memory_space<vmem>>, vector<512x128xbf16>
    %cst = arith.constant dense<0.000000e+00> : vector<16x128xf32>
    %2 = tpu.matmul %0, %1, %cst {dimension_numbers = #tpu.dot_dimension_numbers<[1], [0], [0], [1], [0, 0, 1, 1], [], []>} : vector<16x512xbf16>, vector<512x128xbf16>, vector<16x128xf32> -> vector<16x128xf32>
    %c0_3 = arith.constant 0 : index
    %c0_4 = arith.constant 0 : index
    %3 = vector.load %arg4[%c0_3, %c0_4] : memref<16x128xf32, #tpu.memory_space<vmem>>, vector<16x128xf32>
    tpu.vector_store %arg4[%c0_3, %c0_4], %2 {strides = array<i32>} : memref<16x128xf32, #tpu.memory_space<vmem>>, vector<16x128xf32>,
    return
  }
  func.func @transform_0(%arg0: i32, %arg1: i32) -> (i32, i32) {
    %c0_i32 = arith.constant 0 : i32
    return %arg0, %arg1 : i32, i32
  }
  func.func @transform_1(%arg0: i32, %arg1: i32) -> (i32, i32) {
    %c0_i32 = arith.constant 0 : i32
    %c0_i32_0 = arith.constant 0 : i32
    %c0_i32_1 = arith.constant 0 : i32
    return %c0_i32, %c0_i32_0 : i32, i32
  }
  func.func @transform_2(%arg0: i32, %arg1: i32) -> (i32, i32) {
    %c0_i32 = arith.constant 0 : i32
    return %arg0, %arg1 : i32, i32
  }
}

module attributes {stable_mosaic.version = 11 : i64} {
  func.func @_banded_dequant_kernel(%arg0: i32, %arg1: i32, %arg2: memref<16x384xbf16, #tpu.memory_space<vmem>>, %arg3: memref<384x128xbf16, #tpu.memory_space<vmem>>, %arg4: memref<16x128xf32, #tpu.memory_space<vmem>>) attributes {dimension_semantics = [#tpu.dimension_semantics<parallel>, #tpu.dimension_semantics<parallel>], iteration_bounds = array<i64: 1, 1>, scalar_prefetch = 0 : i64, scratch_operands = 0 : i64, tpu.core_type = #tpu.core_type<tc>, window_params = [{transform_indices = @transform_0, window_bounds = array<i64: 16, 384>}, {pipeline_mode = #tpu.pipeline_mode<synchronous>, transform_indices = @transform_1, window_bounds = array<i64: 384, 128>}, {transform_indices = @transform_2, window_bounds = array<i64: 16, 128>}]} {
    %c0 = arith.constant 0 : index
    %c0_0 = arith.constant 0 : index
    %0 = vector.load %arg2[%c0, %c0_0] : memref<16x384xbf16, #tpu.memory_space<vmem>>, vector<16x384xbf16>
    %c0_1 = arith.constant 0 : index
    %c0_2 = arith.constant 0 : index
    %1 = vector.load %arg3[%c0_1, %c0_2] : memref<384x128xbf16, #tpu.memory_space<vmem>>, vector<384x128xbf16>
    %cst = arith.constant dense<0.000000e+00> : vector<16x128xf32>
    %2 = tpu.matmul %0, %1, %cst {dimension_numbers = #tpu.dot_dimension_numbers<[1], [0], [0], [1], [0, 0, 1, 1], [], []>} : vector<16x384xbf16>, vector<384x128xbf16>, vector<16x128xf32> -> vector<16x128xf32>
    %c0_3 = arith.constant 0 : index
    %c0_4 = arith.constant 0 : index
    %3 = vector.load %arg4[%c0_3, %c0_4] : memref<16x128xf32, #tpu.memory_space<vmem>>, vector<16x128xf32>
    tpu.vector_store %arg4[%c0_3, %c0_4], %2 {strides = array<i32>} : memref<16x128xf32, #tpu.memory_space<vmem>>, vector<16x128xf32>,
    return
  }
  func.func @transform_0(%arg0: i32, %arg1: i32) -> (i32, i32) {
    %c0_i32 = arith.constant 0 : i32
    return %arg0, %arg1 : i32, i32
  }
  func.func @transform_1(%arg0: i32, %arg1: i32) -> (i32, i32) {
    %c0_i32 = arith.constant 0 : i32
    %c0_i32_0 = arith.constant 0 : i32
    %c0_i32_1 = arith.constant 0 : i32
    return %c0_i32, %c0_i32_0 : i32, i32
  }
  func.func @transform_2(%arg0: i32, %arg1: i32) -> (i32, i32) {
    %c0_i32 = arith.constant 0 : i32
    return %arg0, %arg1 : i32, i32
  }
}

</mosaic_0001>

<bundles_post_ra>
// kernel: mix_dequantization.2
= control target key start
LH: loop header
LB: loop body
LE: loop exit
PB: predicated region body
PF: predicated region fallthrough
CT: control target
= control target key end

     0   :  { %v420_v1 = vmov 0.0   ;;  %vm421_vm0 = vmmov 0   ;;  %s524_s1 = inlined_call_operand.vmem [shape: bf16[384,128], index: 1, kind: input, shape index: {}]   ;;  %s525_s0 = inlined_call_operand.vmem [shape: bf16[16,384], index: 0, kind: input, shape index: {}]   ;;  %s526_s2 = inlined_call_operand.vmem [shape: f32[16,128], index: 2, kind: output, shape index: {}]  }
   0x1   :  { %v392_v0 = vld [vmem:[%s524_s1 + $0x40] sm:$0xff]   ;;  %370 = vmatprep.subr.bf16.mxu1 %v420_v1  ;;  %386 = vmatprep.mubr.msk.bf16.mxu1 %vm421_vm0, %v420_v1  ;;  %v395_v4 = vld [vmem:[%s524_s1 + $0x48] sm:$0xff]   ;;  %v398_v7 = vld [vmem:[%s524_s1 + $0x50] sm:$0xff]  }
   0x2   :  { %v393_v2 = vld [vmem:[%s524_s1] sm:$0xff]   ;;  %339 = vmatprep.subr.bf16.mxu0 %v392_v0  ;;  %v396_v5 = vld [vmem:[%s524_s1 + $0x8] sm:$0xff]   ;;  %v399_v8 = vld [vmem:[%s524_s1 + $0x10] sm:$0xff]  }
   0x3   :  { %v394_v3 = vld [vmem:[%s524_s1 + $0x80] sm:$0xff]   ;;  %340 = vmatpush3.bf16.msra.mxu0 %v393_v2  ;;  %v397_v6 = vld [vmem:[%s524_s1 + $0x88] sm:$0xff]   ;;  %v400_v9 = vld [vmem:[%s524_s1 + $0x90] sm:$0xff]  }
   0x4   :  { %371 = vmatpush3.bf16.msra.mxu1 %v394_v3  ;;  %341 = vmatprep.subr.bf16.mxu0 %v395_v4  ;;  %v401_v10 = vld [vmem:[%s524_s1 + $0x58] sm:$0xff]   ;;  %v404_v13 = vld [vmem:[%s524_s1 + $0x60] sm:$0xff]   ;;  %v407_v16 = vld [vmem:[%s524_s1 + $0x68] sm:$0xff]  }
   0x5   :  { %372 = vmatprep.subr.bf16.mxu1 %v420_v1  ;;  %v402_v11 = vld [vmem:[%s524_s1 + $0x18] sm:$0xff]   ;;  %v405_v14 = vld [vmem:[%s524_s1 + $0x20] sm:$0xff]   ;;  %v408_v17 = vld [vmem:[%s524_s1 + $0x28] sm:$0xff]  }
   0x6   :  { %v403_v12 = vld [vmem:[%s524_s1 + $0x98] sm:$0xff]   ;;  %v406_v15 = vld [vmem:[%s524_s1 + $0xa0] sm:$0xff]   ;;  %v409_v18 = vld [vmem:[%s524_s1 + $0xa8] sm:$0xff]  }
   0x7   :  { %342 = vmatpush3.bf16.msra.mxu0 %v396_v5  ;;  %v410_v19 = vld [vmem:[%s524_s1 + $0x70] sm:$0xff]   ;;  %v413_v22 = vld [vmem:[%s524_s1 + $0x78] sm:$0xff]   ;;  %v416_v26 = vld [vmem:[%s525_s0] ss:$12 sps:$4 sm:$0xff]  }
   0x8   :  { %373 = vmatpush3.bf16.msra.mxu1 %v397_v6  ;;  %343 = vmatprep.subr.bf16.mxu0 %v398_v7  ;;  %v411_v20 = vld [vmem:[%s524_s1 + $0x30] sm:$0xff]   ;;  %v414_v24 = vld [vmem:[%s524_s1 + $0x38] sm:$0xff]  }
   0x9   :  { %374 = vmatprep.subr.bf16.mxu1 %v420_v1  ;;  %v412_v21 = vld [vmem:[%s524_s1 + $0xb0] sm:$0xff]   ;;  %v415_v25 = vld [vmem:[%s524_s1 + $0xb8] sm:$0xff]  }
   0xa   :  { %v418_v23 = vld [vmem:[%s525_s0 + $0x4] ss:$12 sps:$4 sm:$0xff]   ;;  %v419_v27 = vld [vmem:[%s525_s0 + $0x8] ss:$12 sps:$4 sm:$0xff]  }
   0xb   :  { %344 = vmatpush3.bf16.msra.mxu0 %v399_v8  ;;  %256 = vmatprep.mubr.bf16.mxu0 %v418_v23 }
   0xc   :  { %375 = vmatpush3.bf16.msra.mxu1 %v400_v9  ;;  %345 = vmatprep.subr.bf16.mxu0 %v401_v10 }
   0xd   :  { %376 = vmatprep.subr.bf16.mxu1 %v420_v1 }
   0xf   :  { %346 = vmatpush3.bf16.msra.mxu0 %v402_v11 }
  0x10   :  { %377 = vmatpush3.bf16.msra.mxu1 %v403_v12  ;;  %347 = vmatprep.subr.bf16.mxu0 %v404_v13 }
  0x11   :  { %378 = vmatprep.subr.bf16.mxu1 %v420_v1 }
  0x13   :  { %348 = vmatpush3.bf16.msra.mxu0 %v405_v14 }
  0x14   :  { %379 = vmatpush3.bf16.msra.mxu1 %v406_v15  ;;  %349 = vmatprep.subr.bf16.mxu0 %v407_v16 }
  0x15   :  { %380 = vmatprep.subr.bf16.mxu1 %v420_v1 }
  0x17   :  { %350 = vmatpush3.bf16.msra.mxu0 %v408_v17 }
  0x18   :  { %381 = vmatpush3.bf16.msra.mxu1 %v409_v18  ;;  %351 = vmatprep.subr.bf16.mxu0 %v410_v19 }
  0x19   :  { %382 = vmatprep.subr.bf16.mxu1 %v420_v1 }
  0x1b   :  { %352 = vmatpush3.bf16.msra.mxu0 %v411_v20 }
  0x1c   :  { %383 = vmatpush3.bf16.msra.mxu1 %v412_v21  ;;  %353 = vmatprep.subr.bf16.mxu0 %v413_v22 }
  0x1d   :  { %384 = vmatprep.subr.bf16.mxu1 %v420_v1 }
  0x1f   :  { %354 = vmatpush3.bf16.msra.mxu0 %v414_v24 }
  0x20   :  { %385 = vmatpush3.bf16.msra.mxu1 %v415_v25 }
  0x22   :  { %257 = vmatmul.mubr.bf16.vlgmr.msra.gmra.mrb[0].mxu0 %v416_v26 }
  0x23   :  { %387 = vmatmul.mubr.bf16.vlgmr.msra.gmra.mrb[0].mxu1 %v419_v27 }
  0xf5   :  { %v355_v28 = vpop.f32.mrb[0].mxu0 }
  0xf6   :  { %v299_v29 = vpop.f32.mrb[0].mxu1  ;;  %v356_v30 = vpop.f32.mrb[1].mxu0 }
  0xf7   :  { %v357_v31 = vadd.f32 %v356_v30, %v355_v28  ;;  %v388_v32 = vpop.f32.mrb[1].mxu1  ;;  %v358_v33 = vpop.f32.mrb[2].mxu0 }
  0xf8   :  { %v302_v34 = vpop.f32.mrb[2].mxu1  ;;  %v359_v35 = vpop.f32.mrb[3].mxu0 }
  0xf9   :  { %v300_v36 = vadd.f32 %v357_v31, %v299_v29  ;;  %v360_v37 = vadd.f32 %v359_v35, %v358_v33  ;;  %v389_v38 = vpop.f32.mrb[3].mxu1 }
  0xfb   :  { %306 = vst [vmem:[%s526_s2] sm:$0xff] %v300_v36  ;;  %v303_v39 = vadd.f32 %v360_v37, %v302_v34 }
  0xfd   :  { %307 = vst [vmem:[%s526_s2 + $0x8] sm:$0xff] %v303_v39 }

// kernel: mix_dequantization.3
= control target key start
LH: loop header
LB: loop body
LE: loop exit
PB: predicated region body
PF: predicated region fallthrough
CT: control target
= control target key end

     0   :  { %7 = vsyncpa [#allocation3], 0  ;;  %s540_s9 = smov [#allocation2]   ;;  %s588_s0 = inlined_call_operand.vmem [shape: bf16[16,512], index: 0, kind: input, shape index: {}]   ;;  %s589_s1 = inlined_call_operand.hbm [shape: bf16[512,128], index: 1, kind: input, shape index: {}]   ;;  %s590_s2 = inlined_call_operand.vmem [shape: f32[16,128], index: 2, kind: output, shape index: {}]  }
   0x1   :  { %s15_s10 = sshll.u32 %s540_s9, 4  ;;  %s516_s13 = scalar_lea.hbm %s589_s1, 4096  ;;  %s16_s10 = int_to_ptr.vmem [resolvable:$true] %s15_s10 }
   0x2   :  { %p517_p0 = scmp.ne.s32.totalorder %s589_s1, %s516_s13  ;;  %p520_p1 = scmp.lt.u32.totalorder %s516_s13, %s589_s1 }
   0x4   :  { %p522_p2 = pnand %p520_p1, %p517_p0 }
   0x6   :  { %525 = shalt.err (!%p522_p2)
}
   0x7   :  { %s526_s18 = scalar_lea.vmem %s16_s10, 4096  ;;  %p531_p4 = scmp.lt.s32.totalorder %s16_s10, %s16_s10 }
   0x8   :  { %p527_p3 = scmp.ne.s32.totalorder %s16_s10, %s526_s18  ;;  %p532_p5 = scmp.lt.s32.totalorder %s526_s18, %s526_s18 }
   0xa   :  { %p533_p6 = por %p532_p5, %p531_p4 }
   0xc   :  { %p534_p7 = pnand %p533_p6, %p527_p3 }
   0xe   :  { %537 = shalt.err (!%p534_p7)
}
   0xf   :  { %s541_s19 = smov 64   ;;  %s542_s20 = smov 4  }
  0x10   :  { %21 = dma.hbm_to_vmem [thread:$0]  %s589_s1, 4096, %s16_s10, [#allocation3], %s541_s19, %s541_s19, %s542_s20  }
  0x11   :  { %538 = dma.done.wait [#allocation3], 4096  }
  0x12   :  { %539 = vsyncadd [#allocation3], 4294963200  ;;  %v478_v0 = vld [vmem:[#allocation2 + $0x40] sm:$0xff]   ;;  %v482_v4 = vld [vmem:[#allocation2 + $0x48] sm:$0xff]  }
  0x13   :  { %v479_v1 = vld [vmem:[#allocation2 + $0xc0] sm:$0xff]   ;;  %431 = vmatprep.subr.bf16.mxu0 %v478_v0  ;;  %v483_v5 = vld [vmem:[#allocation2 + $0xc8] sm:$0xff]   ;;  %v486_v8 = vld [vmem:[#allocation2 + $0x50] sm:$0xff]  }
  0x14   :  { %v480_v2 = vld [vmem:[#allocation2] sm:$0xff]   ;;  %453 = vmatprep.subr.bf16.mxu1 %v479_v1  ;;  %v484_v6 = vld [vmem:[#allocation2 + $0x8] sm:$0xff]   ;;  %v487_v9 = vld [vmem:[#allocation2 + $0xd0] sm:$0xff]  }
  0x15   :  { %v481_v3 = vld [vmem:[#allocation2 + $0x80] sm:$0xff]   ;;  %432 = vmatpush3.bf16.msra.mxu0 %v480_v2  ;;  %v485_v7 = vld [vmem:[#allocation2 + $0x88] sm:$0xff]   ;;  %v488_v10 = vld [vmem:[#allocation2 + $0x10] sm:$0xff]  }
  0x16   :  { %454 = vmatpush3.bf16.msra.mxu1 %v481_v3  ;;  %433 = vmatprep.subr.bf16.mxu0 %v482_v4  ;;  %v489_v11 = vld [vmem:[#allocation2 + $0x90] sm:$0xff]   ;;  %v490_v12 = vld [vmem:[#allocation2 + $0x58] sm:$0xff]   ;;  %v494_v16 = vld [vmem:[#allocation2 + $0x60] sm:$0xff]  }
  0x17   :  { %455 = vmatprep.subr.bf16.mxu1 %v483_v5  ;;  %v491_v13 = vld [vmem:[#allocation2 + $0xd8] sm:$0xff]   ;;  %v495_v17 = vld [vmem:[#allocation2 + $0xe0] sm:$0xff]   ;;  %v498_v20 = vld [vmem:[#allocation2 + $0x68] sm:$0xff]  }
  0x18   :  { %v492_v14 = vld [vmem:[#allocation2 + $0x18] sm:$0xff]   ;;  %v496_v18 = vld [vmem:[#allocation2 + $0x20] sm:$0xff]   ;;  %v499_v21 = vld [vmem:[#allocation2 + $0xe8] sm:$0xff]  }
  0x19   :  { %434 = vmatpush3.bf16.msra.mxu0 %v484_v6  ;;  %v493_v15 = vld [vmem:[#allocation2 + $0x98] sm:$0xff]   ;;  %v497_v19 = vld [vmem:[#allocation2 + $0xa0] sm:$0xff]   ;;  %v500_v22 = vld [vmem:[#allocation2 + $0x28] sm:$0xff]  }
  0x1a   :  { %456 = vmatpush3.bf16.msra.mxu1 %v485_v7  ;;  %435 = vmatprep.subr.bf16.mxu0 %v486_v8  ;;  %v501_v23 = vld [vmem:[#allocation2 + $0xa8] sm:$0xff]   ;;  %v502_v24 = vld [vmem:[#allocation2 + $0x70] sm:$0xff]   ;;  %v506_v28 = vld [vmem:[#allocation2 + $0x78] sm:$0xff]  }
  0x1b   :  { %457 = vmatprep.subr.bf16.mxu1 %v487_v9  ;;  %v503_v25 = vld [vmem:[#allocation2 + $0xf0] sm:$0xff]   ;;  %v507_v29 = vld [vmem:[#allocation2 + $0xf8] sm:$0xff]  }
  0x1c   :  { %v504_v26 = vld [vmem:[#allocation2 + $0x30] sm:$0xff]   ;;  %v508_v30 = vld [vmem:[#allocation2 + $0x38] sm:$0xff]  }
  0x1d   :  { %436 = vmatpush3.bf16.msra.mxu0 %v488_v10  ;;  %v505_v27 = vld [vmem:[#allocation2 + $0xb0] sm:$0xff]   ;;  %v509_v31 = vld [vmem:[#allocation2 + $0xb8] sm:$0xff]  }
  0x1e   :  { %458 = vmatpush3.bf16.msra.mxu1 %v489_v11  ;;  %437 = vmatprep.subr.bf16.mxu0 %v490_v12  ;;  %v510_v32 = vld [vmem:[%s588_s0] ss:$16 sps:$4 sm:$0xff]   ;;  %v512_v33 = vld [vmem:[%s588_s0 + $0x4] ss:$16 sps:$4 sm:$0xff]   ;;  %v513_v34 = vld [vmem:[%s588_s0 + $0x8] ss:$16 sps:$4 sm:$0xff]  }
  0x1f   :  { %459 = vmatprep.subr.bf16.mxu1 %v491_v13  ;;  %v515_v35 = vld [vmem:[%s588_s0 + $0xc] ss:$16 sps:$4 sm:$0xff]   ;;  %338 = vmatprep.mubr.bf16.mxu0 %v512_v33 }
  0x20   :  { %379 = vmatprep.mubr.bf16.mxu1 %v515_v35 }
  0x21   :  { %438 = vmatpush3.bf16.msra.mxu0 %v492_v14 }
  0x22   :  { %460 = vmatpush3.bf16.msra.mxu1 %v493_v15  ;;  %439 = vmatprep.subr.bf16.mxu0 %v494_v16 }
  0x23   :  { %461 = vmatprep.subr.bf16.mxu1 %v495_v17 }
  0x25   :  { %440 = vmatpush3.bf16.msra.mxu0 %v496_v18 }
  0x26   :  { %462 = vmatpush3.bf16.msra.mxu1 %v497_v19  ;;  %441 = vmatprep.subr.bf16.mxu0 %v498_v20 }
  0x27   :  { %463 = vmatprep.subr.bf16.mxu1 %v499_v21 }
  0x29   :  { %442 = vmatpush3.bf16.msra.mxu0 %v500_v22 }
  0x2a   :  { %464 = vmatpush3.bf16.msra.mxu1 %v501_v23  ;;  %443 = vmatprep.subr.bf16.mxu0 %v502_v24 }
  0x2b   :  { %465 = vmatprep.subr.bf16.mxu1 %v503_v25 }
  0x2d   :  { %444 = vmatpush3.bf16.msra.mxu0 %v504_v26 }
  0x2e   :  { %466 = vmatpush3.bf16.msra.mxu1 %v505_v27  ;;  %445 = vmatprep.subr.bf16.mxu0 %v506_v28 }
  0x2f   :  { %467 = vmatprep.subr.bf16.mxu1 %v507_v29 }
  0x31   :  { %446 = vmatpush3.bf16.msra.mxu0 %v508_v30 }
  0x32   :  { %468 = vmatpush3.bf16.msra.mxu1 %v509_v31 }
  0x34   :  { %339 = vmatmul.mubr.bf16.vlgmr.msra.gmra.mrb[0].mxu0 %v510_v32 }
  0x35   :  { %380 = vmatmul.mubr.bf16.vlgmr.msra.gmra.mrb[0].mxu1 %v513_v34 }
 0x107   :  { %v447_v36 = vpop.f32.mrb[0].mxu0 }
 0x108   :  { %v469_v37 = vpop.f32.mrb[0].mxu1  ;;  %v448_v38 = vpop.f32.mrb[1].mxu0 }
 0x109   :  { %v449_v39 = vadd.f32 %v448_v38, %v447_v36  ;;  %v470_v40 = vpop.f32.mrb[1].mxu1  ;;  %v450_v41 = vpop.f32.mrb[2].mxu0 }
 0x10a   :  { %v471_v42 = vadd.f32 %v470_v40, %v469_v37  ;;  %v472_v43 = vpop.f32.mrb[2].mxu1  ;;  %v451_v44 = vpop.f32.mrb[3].mxu0 }
 0x10b   :  { %v452_v45 = vadd.f32 %v451_v44, %v450_v41  ;;  %v473_v46 = vpop.f32.mrb[3].mxu1 }
 0x10c   :  { %v382_v47 = vadd.f32 %v471_v42, %v449_v39  ;;  %v474_v48 = vadd.f32 %v473_v46, %v472_v43 }
 0x10e   :  { %388 = vst [vmem:[%s590_s2] sm:$0xff] %v382_v47  ;;  %v385_v49 = vadd.f32 %v474_v48, %v452_v45 }
 0x110   :  { %389 = vst [vmem:[%s590_s2 + $0x8] sm:$0xff] %v385_v49 }
 0x111   :  { %394 = vsyncpa [#allocation3], 1 }

</bundles_post_ra>
